<compile_context>
chip_gen: v5e
topology: v5e:2x2
jax: 0.10.0
libtpu: 0.0.40
codegen_flags: <defaults>
</compile_context>

<pallas_src>
import functools

import jax
import jax.numpy as jnp
from jax import lax
from jax.experimental import pallas as pl
from jax.experimental.pallas import tpu as pltpu


_CORE_PARALLEL = getattr(pltpu, "CORE_PARALLEL", None)
_PARALLEL = getattr(pltpu, "PARALLEL", "parallel")


def _tpu_vmem_capacity_bytes():
    """Physical VMEM per core, with a conservative fallback (v7x = 64 MiB)."""
    try:
        cap = int(getattr(pltpu.get_tpu_info(), "vmem_capacity_bytes", 0))
        if cap > 0:
            return cap
    except Exception:
        pass
    return 64 << 20


def _chip_is_multicore():
    """True for chips with >1 TensorCore per device (v4 / v5p / v7x)."""
    try:
        kind = jax.devices()[0].device_kind.lower()
    except Exception:
        return False
    return any(tag in kind for tag in ("v4", "v5p", "v7", "7x"))


def _choose_blocks(L, B, H, w_itemsize, cls_itemsize, out_itemsize, budget_bytes, min_steps):
    """Pick (layer_block, col_block) so every double-buffered pipeline block fits the budget."""

    def footprint(lb, tn):
        w = lb * H * tn * w_itemsize          # streamed weights
        cls = lb * B * H * cls_itemsize       # CLS activations
        out = lb * B * tn * out_itemsize      # pooled outputs
        sb = 2 * lb * tn * 4                  # dequant scale + bias (f32)
        return 2 * (w + cls + out + sb)       # x2: double-buffered pipeline

    def divisors(n):
        return [d for d in range(1, n + 1) if n % d == 0]

    # Prefer full weight rows (tn = H); shrink output columns (lane-dense multiples of 128)
    # only when a single layer's weight block would blow the budget.
    col_candidates = [H]
    if H % 128 == 0:
        col_candidates += sorted(
            (d * 128 for d in divisors(H // 128) if d * 128 != H), reverse=True)

    layer_divs = divisors(L)
    for tn in col_candidates:
        fitting = [lb for lb in layer_divs if footprint(lb, tn) <= budget_bytes]
        if not fitting:
            continue
        steps = lambda lb: (L // lb) * (H // tn)
        preferred = [lb for lb in fitting if steps(lb) >= min_steps]
        return (max(preferred) if preferred else max(fitting)), tn
    return 1, col_candidates[-1]  # last resort: smallest expressible block


def _pooler_kernel(cls_ref, w_ref, s_ref, b_ref, o_ref, *, layer_block):
    # cls_ref: (Lb, B, H)        bf16  CLS hidden states for this layer block
    # w_ref:   (Lb, H, tn)       int8/bf16 weights, pre-transposed to (in, out)
    # s_ref:   (Lb, 1, tn)       f32   per-output-channel dequant scales
    # b_ref:   (Lb, 1, tn)       f32   biases
    # o_ref:   (Lb, B, tn)       f32   pooled outputs
    def body(l, carry):
        x = cls_ref[l]                                    # (B, H) bf16
        w = w_ref[l].astype(x.dtype)                      # int8 -> bf16 (exact), rides VPU slack
        y = jnp.dot(x, w, preferred_element_type=jnp.float32)   # MXU, f32 accumulation
        y = y * s_ref[l] + b_ref[l]                       # dequant + bias epilogue
        o_ref[l] = jnp.tanh(y).astype(o_ref.dtype)        # EUP tanh
        return carry

    lax.fori_loop(0, layer_block, body, 0, unroll=True)


def bert_poolers_pallas(cls_tokens, w_stream, scale, bias, *,
                        layer_block=None, col_block=None):
    """Per-layer BertPooler (Linear + tanh) over CLS tokens.

    cls_tokens: (L, B, H) bfloat16 CLS hidden states
    w_stream:   (L, H, H) weights pre-transposed to (in, out), int8 (quantized) or bfloat16
    scale:      (L, 1, H) float32 per-output-channel dequant scales (ones for bf16 weights)
    bias:       (L, 1, H) float32 biases
    returns:    (L, B, H) float32 pooled outputs
    """
    L, B, H = cls_tokens.shape
    assert w_stream.shape == (L, H, H)
    assert scale.shape == (L, 1, H) and bias.shape == (L, 1, H)

    cap = _tpu_vmem_capacity_bytes()
    budget = int(cap * 0.30)                       # all double-buffered blocks ~30% of physical VMEM
    vmem_limit = int(min(cap * 0.75, 96 << 20))    # raise scoped limit, keep physical headroom
    multicore = _chip_is_multicore()
    min_steps = 4 if multicore else 2              # >=2 per TC for double-buffer overlap

    if layer_block is None or col_block is None:
        lb, tn = _choose_blocks(
            L, B, H,
            jnp.dtype(w_stream.dtype).itemsize,
            jnp.dtype(cls_tokens.dtype).itemsize,
            4,  # f32 output
            budget, min_steps)
        layer_block = layer_block or lb
        col_block = col_block or tn
    assert L % layer_block == 0 and H % col_block == 0, (L, layer_block, H, col_block)

    grid = (L // layer_block, H // col_block)

    cost = pl.CostEstimate(
        flops=2 * L * B * H * H,
        transcendentals=L * B * H,
        bytes_accessed=(w_stream.size * jnp.dtype(w_stream.dtype).itemsize
                        + grid[1] * cls_tokens.size * jnp.dtype(cls_tokens.dtype).itemsize
                        + (scale.size + bias.size) * 4
                        + L * B * H * 4),
    )

    kernel = functools.partial(_pooler_kernel, layer_block=layer_block)

    grid_spec = pltpu.PrefetchScalarGridSpec(
        num_scalar_prefetch=0,
        grid=grid,
        in_specs=[
            pl.BlockSpec((layer_block, B, H), lambda g, n: (g, 0, 0)),
            pl.BlockSpec((layer_block, H, col_block), lambda g, n: (g, 0, n)),
            pl.BlockSpec((layer_block, 1, col_block), lambda g, n: (g, 0, n)),
            pl.BlockSpec((layer_block, 1, col_block), lambda g, n: (g, 0, n)),
        ],
        out_specs=pl.BlockSpec((layer_block, B, col_block), lambda g, n: (g, 0, n)),
    )

    # Both grid axes are independent (no reduction): layer axis gets CORE_PARALLEL on
    # multi-TensorCore chips so the two TCs split the dominant weight stream.
    semantic_candidates = []
    if multicore and _CORE_PARALLEL is not None and grid[0] >= 2:
        semantic_candidates.append((_CORE_PARALLEL, _PARALLEL))
    semantic_candidates.append(("parallel", "parallel"))

    last_err = None
    for sems in semantic_candidates:
        try:
            call = pl.pallas_call(
                kernel,
                out_shape=jax.ShapeDtypeStruct((L, B, H), jnp.float32),
                grid_spec=grid_spec,
                compiler_params=pltpu.CompilerParams(
                    dimension_semantics=sems,
                    vmem_limit_bytes=vmem_limit),
                cost_estimate=cost,
            )
            return call(cls_tokens, w_stream, scale, bias)
        except Exception as e:  # pragma: no cover — fall back if CORE_PARALLEL is unsupported here
            last_err = e
    raise last_err


class BaseEarlyExitModelPallas:
    """JAX/Pallas analogue of BaseEarlyExitModel's concrete pieces (dropout + per-layer poolers)."""

    def __init__(self, num_hidden_layers: int, hidden_size: int, num_labels: int,
                 dropout: float = 0.0, key=None, weight_stream_dtype="int8"):
        self.num_hidden_layers = num_hidden_layers
        self.hidden_size = hidden_size
        self.num_labels = num_labels
        self.dropout_p = dropout  # p=0.0 -> identity (eval-mode dropout)

        if key is None:
            key = jax.random.PRNGKey(0)
        kw, kb = jax.random.split(key)
        # fp32 master copies, PyTorch Linear layout (out, in) — kept for reference/export.
        self.pooler_weights = (
            jax.random.normal(kw, (num_hidden_layers, hidden_size, hidden_size),
                              dtype=jnp.float32) * 0.02)
        self.pooler_biases = (
            jax.random.normal(kb, (num_hidden_layers, hidden_size), dtype=jnp.float32) * 0.02)

        # One-time kernel-ready cache: (out,in)->(in,out) transpose + 8-bit weight stream.
        w_t = jnp.transpose(self.pooler_weights, (0, 2, 1))               # (L, H_in, H_out)
        if weight_stream_dtype == "int8":
            absmax = jnp.max(jnp.abs(w_t), axis=1, keepdims=True)         # per-output-channel
            scale = jnp.maximum(absmax, 1e-8) / 127.0                     # (L, 1, H_out)
            self._w_stream = jnp.clip(jnp.round(w_t / scale), -127, 127).astype(jnp.int8)
            self._scale = scale.astype(jnp.float32)
        else:
            self._w_stream = w_t.astype(jnp.bfloat16)
            self._scale = jnp.ones((num_hidden_layers, 1, hidden_size), jnp.float32)
        self._b = self.pooler_biases.reshape(num_hidden_layers, 1, hidden_size)

    def dequantized_weights(self):
        """(L, in, out) float32 weights exactly as the kernel sees them (for validation)."""
        return self._w_stream.astype(jnp.float32) * self._scale

    def pool(self, hidden_states):
        """hidden_states: (L, B, S, H). Returns pooled (L, B, H) float32."""
        # BertPooler takes the first (CLS) token; single bf16 cast hoisted into the wrapper.
        cls_tokens = hidden_states[:, :, 0, :].astype(jnp.bfloat16)
        pooled = bert_poolers_pallas(cls_tokens, self._w_stream, self._scale, self._b)
        # dropout with p=0.0 is identity.
        # TODO(synk): stochastic dropout (p > 0) training path not implemented; eval-path only.
        return pooled

    # forward / forward_force_exit / forward_early_exit are abstract in the reference module.
    # TODO(synk): subclasses define classification heads / exit criteria over the pooled outputs.


if __name__ == "__main__":
    key = jax.random.PRNGKey(0)
    L, B, S, H = 4, 8, 8, 128      # H lane-dense (multiple of 128) -> unmasked full-lane stores
    k_in, k_model = jax.random.split(key)

    hidden_states = jax.random.normal(k_in, (L, B, S, H), dtype=jnp.float32)

    model = BaseEarlyExitModelPallas(num_hidden_layers=L, hidden_size=H,
                                     num_labels=3, dropout=0.0, key=k_model)

    pooled = jax.block_until_ready(model.pool(hidden_states))
    assert pooled.shape == (L, B, H)

    # Tight check: against what the kernel mathematically computes
    # (bf16 CLS tokens, dequantized int8 weights, fp32 accumulation).
    cls_bf = hidden_states[:, :, 0, :].astype(jnp.bfloat16).astype(jnp.float32)
    ref_q = jnp.tanh(
        jnp.einsum("lbk,lko->lbo", cls_bf, model.dequantized_weights(), precision="highest")
        + model.pooler_biases[:, None, :])
    err_q = float(jnp.max(jnp.abs(pooled - ref_q)))
    assert err_q < 2e-3, f"kernel vs dequantized reference: {err_q}"

    # Loose check: against the fp32 PyTorch-equivalent reference (int8 weight-stream tolerance).
    ref = jnp.tanh(
        jnp.einsum("lbh,loh->lbo", hidden_states[:, :, 0, :], model.pooler_weights,
                   precision="highest")
        + model.pooler_biases[:, None, :])
    err = float(jnp.max(jnp.abs(pooled - ref)))
    assert err < 3e-2, f"kernel vs fp32 reference: {err}"

    print("KERNEL_OK")
</pallas_src>

<mosaic_0001>
module attributes {stable_mosaic.version = 11 : i64} {
  func.func @_pooler_kernel(%arg0: i32, %arg1: i32, %arg2: memref<2x8x128xbf16, #tpu.memory_space<vmem>>, %arg3: memref<2x128x128xi8, #tpu.memory_space<vmem>>, %arg4: memref<2x1x128xf32, #tpu.memory_space<vmem>>, %arg5: memref<2x1x128xf32, #tpu.memory_space<vmem>>, %arg6: memref<2x8x128xf32, #tpu.memory_space<vmem>>) attributes {dimension_semantics = [#tpu.dimension_semantics<parallel>, #tpu.dimension_semantics<parallel>], iteration_bounds = array<i64: 2, 1>, scalar_prefetch = 0 : i64, scratch_operands = 0 : i64, tpu.core_type = #tpu.core_type<tc>, window_params = [{transform_indices = @transform_0, window_bounds = array<i64: 2, 8, 128>}, {transform_indices = @transform_1, window_bounds = array<i64: 2, 128, 128>}, {transform_indices = @transform_2, window_bounds = array<i64: 2, 1, 128>}, {transform_indices = @transform_3, window_bounds = array<i64: 2, 1, 128>}, {transform_indices = @transform_4, window_bounds = array<i64: 2, 8, 128>}]} {
    %c0_i32 = arith.constant 0 : i32
    %0 = arith.index_cast %c0_i32 : i32 to index
    %c0 = arith.constant 0 : index
    %c0_0 = arith.constant 0 : index
    %1 = vector.load %arg2[%0, %c0, %c0_0] : memref<2x8x128xbf16, #tpu.memory_space<vmem>>, vector<1x8x128xbf16>
    %2 = vector.shape_cast %1 : vector<1x8x128xbf16> to vector<8x128xbf16>
    %3 = arith.index_cast %c0_i32 : i32 to index
    %c0_1 = arith.constant 0 : index
    %c0_2 = arith.constant 0 : index
    %4 = vector.load %arg3[%3, %c0_1, %c0_2] : memref<2x128x128xi8, #tpu.memory_space<vmem>>, vector<1x128x128xi8>
    %5 = vector.shape_cast %4 : vector<1x128x128xi8> to vector<128x128xi8>
    %6 = arith.sitofp %5 : vector<128x128xi8> to vector<128x128xbf16>
    %cst = arith.constant dense<0.000000e+00> : vector<8x128xf32>
    %7 = tpu.matmul %2, %6, %cst {dimension_numbers = #tpu.dot_dimension_numbers<[1], [0], [0], [1], [0, 0, 1, 1], [], []>} : vector<8x128xbf16>, vector<128x128xbf16>, vector<8x128xf32> -> vector<8x128xf32>
    %8 = arith.index_cast %c0_i32 : i32 to index
    %c0_3 = arith.constant 0 : index
    %c0_4 = arith.constant 0 : index
    %9 = vector.load %arg4[%8, %c0_3, %c0_4] : memref<2x1x128xf32, #tpu.memory_space<vmem>>, vector<1x1x128xf32>
    %10 = vector.shape_cast %9 : vector<1x1x128xf32> to vector<1x128xf32>
    %11 = vector.broadcast %10 : vector<1x128xf32> to vector<8x128xf32>
    %12 = arith.mulf %7, %11 : vector<8x128xf32>
    %13 = arith.index_cast %c0_i32 : i32 to index
    %c0_5 = arith.constant 0 : index
    %c0_6 = arith.constant 0 : index
    %14 = vector.load %arg5[%13, %c0_5, %c0_6] : memref<2x1x128xf32, #tpu.memory_space<vmem>>, vector<1x1x128xf32>
    %15 = vector.shape_cast %14 : vector<1x1x128xf32> to vector<1x128xf32>
    %16 = vector.broadcast %15 : vector<1x128xf32> to vector<8x128xf32>
    %17 = arith.addf %12, %16 : vector<8x128xf32>
    %18 = math.tanh %17 : vector<8x128xf32>
    %19 = arith.index_cast %c0_i32 : i32 to index
    %c0_7 = arith.constant 0 : index
    %c0_8 = arith.constant 0 : index
    %20 = vector.load %arg6[%19, %c0_7, %c0_8] : memref<2x8x128xf32, #tpu.memory_space<vmem>>, vector<1x8x128xf32>
    %21 = vector.shape_cast %20 : vector<1x8x128xf32> to vector<8x128xf32>
    %22 = vector.shape_cast %18 : vector<8x128xf32> to vector<1x8x128xf32>
    tpu.vector_store %arg6[%19, %c0_7, %c0_8], %22 {strides = array<i32>} : memref<2x8x128xf32, #tpu.memory_space<vmem>>, vector<1x8x128xf32>,
    %c1_i32 = arith.constant 1 : i32
    %23 = arith.index_cast %c1_i32 : i32 to index
    %c0_9 = arith.constant 0 : index
    %c0_10 = arith.constant 0 : index
    %24 = vector.load %arg2[%23, %c0_9, %c0_10] : memref<2x8x128xbf16, #tpu.memory_space<vmem>>, vector<1x8x128xbf16>
    %25 = vector.shape_cast %24 : vector<1x8x128xbf16> to vector<8x128xbf16>
    %26 = arith.index_cast %c1_i32 : i32 to index
    %c0_11 = arith.constant 0 : index
    %c0_12 = arith.constant 0 : index
    %27 = vector.load %arg3[%26, %c0_11, %c0_12] : memref<2x128x128xi8, #tpu.memory_space<vmem>>, vector<1x128x128xi8>
    %28 = vector.shape_cast %27 : vector<1x128x128xi8> to vector<128x128xi8>
    %29 = arith.sitofp %28 : vector<128x128xi8> to vector<128x128xbf16>
    %cst_13 = arith.constant dense<0.000000e+00> : vector<8x128xf32>
    %30 = tpu.matmul %25, %29, %cst_13 {dimension_numbers = #tpu.dot_dimension_numbers<[1], [0], [0], [1], [0, 0, 1, 1], [], []>} : vector<8x128xbf16>, vector<128x128xbf16>, vector<8x128xf32> -> vector<8x128xf32>
    %31 = arith.index_cast %c1_i32 : i32 to index
    %c0_14 = arith.constant 0 : index
    %c0_15 = arith.constant 0 : index
    %32 = vector.load %arg4[%31, %c0_14, %c0_15] : memref<2x1x128xf32, #tpu.memory_space<vmem>>, vector<1x1x128xf32>
    %33 = vector.shape_cast %32 : vector<1x1x128xf32> to vector<1x128xf32>
    %34 = vector.broadcast %33 : vector<1x128xf32> to vector<8x128xf32>
    %35 = arith.mulf %30, %34 : vector<8x128xf32>
    %36 = arith.index_cast %c1_i32 : i32 to index
    %c0_16 = arith.constant 0 : index
    %c0_17 = arith.constant 0 : index
    %37 = vector.load %arg5[%36, %c0_16, %c0_17] : memref<2x1x128xf32, #tpu.memory_space<vmem>>, vector<1x1x128xf32>
    %38 = vector.shape_cast %37 : vector<1x1x128xf32> to vector<1x128xf32>
    %39 = vector.broadcast %38 : vector<1x128xf32> to vector<8x128xf32>
    %40 = arith.addf %35, %39 : vector<8x128xf32>
    %41 = math.tanh %40 : vector<8x128xf32>
    %42 = arith.index_cast %c1_i32 : i32 to index
    %c0_18 = arith.constant 0 : index
    %c0_19 = arith.constant 0 : index
    %43 = vector.load %arg6[%42, %c0_18, %c0_19] : memref<2x8x128xf32, #tpu.memory_space<vmem>>, vector<1x8x128xf32>
    %44 = vector.shape_cast %43 : vector<1x8x128xf32> to vector<8x128xf32>
    %45 = vector.shape_cast %41 : vector<8x128xf32> to vector<1x8x128xf32>
    tpu.vector_store %arg6[%42, %c0_18, %c0_19], %45 {strides = array<i32>} : memref<2x8x128xf32, #tpu.memory_space<vmem>>, vector<1x8x128xf32>,
    %c2_i32 = arith.constant 2 : i32
    return
  }
  func.func @transform_0(%arg0: i32, %arg1: i32) -> (i32, i32, i32) {
    %c0_i32 = arith.constant 0 : i32
    %c0_i32_0 = arith.constant 0 : i32
    %c0_i32_1 = arith.constant 0 : i32
    return %arg0, %c0_i32, %c0_i32_0 : i32, i32, i32
  }
  func.func @transform_1(%arg0: i32, %arg1: i32) -> (i32, i32, i32) {
    %c0_i32 = arith.constant 0 : i32
    %c0_i32_0 = arith.constant 0 : i32
    return %arg0, %c0_i32, %arg1 : i32, i32, i32
  }
  func.func @transform_2(%arg0: i32, %arg1: i32) -> (i32, i32, i32) {
    %c0_i32 = arith.constant 0 : i32
    %c0_i32_0 = arith.constant 0 : i32
    return %arg0, %c0_i32, %arg1 : i32, i32, i32
  }
  func.func @transform_3(%arg0: i32, %arg1: i32) -> (i32, i32, i32) {
    %c0_i32 = arith.constant 0 : i32
    %c0_i32_0 = arith.constant 0 : i32
    return %arg0, %c0_i32, %arg1 : i32, i32, i32
  }
  func.func @transform_4(%arg0: i32, %arg1: i32) -> (i32, i32, i32) {
    %c0_i32 = arith.constant 0 : i32
    %c0_i32_0 = arith.constant 0 : i32
    return %arg0, %c0_i32, %arg1 : i32, i32, i32
  }
}

</mosaic_0001>

<bundles_post_ra>
// kernel: tpu_custom_call.1
= control target key start
LH: loop header
LB: loop body
LE: loop exit
PB: predicated region body
PF: predicated region fallthrough
CT: control target
= control target key end

     0   :  { %s1259_s0 = inlined_call_operand.hbm [shape: bf16[4,8,128], index: 0, kind: input, shape index: {}]   ;;  %s1260_s1 = inlined_call_operand.hbm [shape: s8[4,128,128], index: 1, kind: input, shape index: {}]   ;;  %s1261_s2 = inlined_call_operand.hbm [shape: f32[4,1,128], index: 2, kind: input, shape index: {}]   ;;  %s1262_s3 = inlined_call_operand.hbm [shape: f32[4,1,128], index: 3, kind: input, shape index: {}]   ;;  %s1263_s4 = inlined_call_operand.hbm [shape: f32[4,8,128], index: 4, kind: output, shape index: {}]  }
   0x1   :  { %1269 = sst [smem:[#allocation20_spill]] %s1259_s0 }
   0x2   :  { %1270 = sst [smem:[#allocation21_spill]] %s1260_s1 }
   0x3   :  { %9 = vsyncpa [#allocation3], 0 }
   0x4   :  { %11 = vsyncpa [#allocation3 + $0x1], 0 }
   0x5   :  { %12 = vsyncpa [#allocation6], 0 }
   0x6   :  { %14 = vsyncpa [#allocation6 + $0x1], 0 }
   0x7   :  { %15 = vsyncpa [#allocation9], 0 }
   0x8   :  { %17 = vsyncpa [#allocation9 + $0x1], 0 }
   0x9   :  { %18 = vsyncpa [#allocation4], 0 }
   0xa   :  { %20 = vsyncpa [#allocation4 + $0x1], 0  ;;  %s1059_s15 = smov 0   ;;  %s1061_s16 = smov 0  }
   0xb   :  { %s1063_s17 = smov 0   ;;  %s1065_s18 = smov 0  }
   0xc   :  { %s1067_s19 = smov 0   ;;  %s1069_s20 = smov 0  }
   0xd LB: > { %1271 = sst [smem:[#allocation15_spill]] %s1012_s17  ;;  %s1090_s21 = sadd.s32 4294967295, %s1024_s20   ;;  %s1024_s20 = sphi %s1069_s20, %s26_s20   ;;  %s1020_s19 = sphi %s1067_s19, %s1292_s19   ;;  %s1016_s18 = sphi %s1065_s18, %s1291_s18   ;;  %s1012_s17 = sphi %s1063_s17, %s1287_s17   ;;  %s1008_s16 = sphi %s1061_s16, %s1290_s16   ;;  %s1004_s15 = sphi %s1059_s15, %s1289_s15  }
   0xe   : > { %1272 = sst [smem:[#allocation16_spill]] %s1024_s20  ;;  %s684_s22 = sadd.s32 4294967294, %s1024_s20  }
   0xf   : > { %s38_s23 = sadd.s32 1, %s1020_s19  ;;  %s45_s24 = sadd.s32 1, %s1012_s17 }
  0x10   : > { %p40_p0 = scmp.ge.s32.totalorder %s38_s23, 2  ;;  %p52_p1 = scmp.ne.s32.totalorder %s1012_s17, %s1008_s16 }
  0x11   : > { %p53_p2 = scmp.eq.s32.totalorder %s1024_s20, 0  ;;  %p58_p3 = scmp.ne.s32.totalorder %s1008_s16, %s1004_s15 }
  0x12   : > { %s1294_s23 = smov (%p40_p0, %s38_s23), 0  ;;  %p59_p5 = scmp.eq.s32.totalorder %s1090_s21, 0 }
  0x13   : > { %1273 = sst [smem:[#allocation17_spill]] %s1294_s23  ;;  %p1102_p4 = por %p53_p2, %p52_p1 }
  0x14   : > { %s42_s26 = ssub.s32 %s1020_s19, %s1294_s23  ;;  %p168_p6 = scmp.eq.s32.totalorder %s1090_s21, 1 }
  0x15   : > { %p43_p7 = scmp.eq.s32.totalorder %s42_s26, 0  ;;  %p1110_p8 = por %p59_p5, %p58_p3 }
  0x16   : > { %p1114_p9 = por %p168_p6, %p52_p1  ;;  %p174_p10 = scmp.eq.s32.totalorder %s684_s22, 1 }
  0x17   : > { %s1119_s29 = scalar_select %p43_p7, %s1012_s17, %s45_s24  }
  0x18   : > { %p1121_p11 = por %p174_p10, %p58_p3  ;;  %p686_p12 = scmp.ge.s32.totalorder %s1024_s20, 2 }
  0x19   : > { %1277 = sst [smem:[#allocation18_spill]] %s1119_s29  ;;  %p748_p13 = scmp.lt.s32.totalorder %s1024_s20, 2 }
  0x1a   : > { %s1278_s30 = scalar_select %p1121_p11, 1, 0 }
  0x1b   : > { %s1128_s5 = sand.u32 1, %s1012_s17   ;;  %s216_s6 = sand.u32 1, %s1024_s20  }
  0x1c   : > { %1279 = sst [smem:[#allocation19_spill]] %s1278_s30  ;;  %s690_s7 = sshll.u32 %s1128_s5, 6 }
  0x1d   : > { %p1134_p0 = pnand %p748_p13, %p1102_p4  ;;  %s719_s9 = sshll.u32 %s1020_s19, 6 }
  0x1e   : > { %s1281_s1 = sld [smem:[#allocation21_spill]]  ;;  %s220_s14 = scalar_lea.vmem [#allocation5], %s690_s7 }
  0x1f   : > { %s230_s22 = sshll.u32 %s220_s14, 4  ;;  %s1142_s24 = scalar_lea.sflag [#allocation6], %s216_s6  ;;  %s231_s22 = int_to_ptr.vmem [resolvable:$true] %s230_s22 }
  0x20   : > { %s1026_s25 = smov 128   ;;  %s1027_s26 = smov 8  }
  0x21   : > { %p698_p1 = scmp.ge.s32.totalorder %s1024_s20, 1  ;;  %p282_p2 = scmp.lt.s32.totalorder %s1024_s20, 3 }
  0x22   : > { %s687_s7 = sshll.u32 %s1128_s5, 3  ;;  %s717_s10 = sshll.u32 %s1020_s19, 3 }
  0x23   : > { %p1149_p3 = pnand %p698_p1, %p282_p2  ;;  %s1283_s0 = sld [smem:[#allocation20_spill]] }
  0x24   : > { %s227_s12 = scalar_lea.hbm %s1281_s1, %s719_s9  ;;  %s198_s1 = scalar_lea.vmem [#allocation2], %s687_s7 }
  0x25   : > { %s228_s13 = sshll.u32 %s227_s12, 4  ;;  %s206_s23 = sshll.u32 %s198_s1, 4  ;;  %s229_s13 = int_to_ptr.hbm [resolvable:$true] %s228_s13  ;;  %s207_s23 = int_to_ptr.vmem [resolvable:$true] %s206_s23 }
  0x26   : > { %737 = dma.hbm_to_vmem [thread:$0]  (!%p1134_p0), %s229_s13, 1024, %s231_s22, %s1142_s24, %s1026_s25, %s1026_s25, %s1027_s26  }
  0x27   : > { %s195_s13 = scalar_lea.sflag [#allocation3], %s1128_s5  ;;  %s1028_s22 = smov 64  }
  0x28   : > { %s1029_s25 = smov 4   ;;  %s694_s26 = sshll.u32 %s1128_s5, 1 }
  0x29   : > { %s203_s6 = scalar_lea.hbm %s1283_s0, %s717_s10  ;;  %s695_s29 = sshll.u32 %s1020_s19, 1 }
  0x2a   : > { %s204_s14 = sshll.u32 %s203_s6, 4  ;;  %s249_s11 = scalar_lea.hbm %s1261_s2, %s695_s29  ;;  %s205_s14 = int_to_ptr.hbm [resolvable:$true] %s204_s14 }
  0x2b   : > { %734 = dma.hbm_to_vmem [thread:$0]  (!%p1134_p0), %s205_s14, 128, %s207_s23, %s195_s13, %s1028_s22, %s1028_s22, %s1029_s25  }
  0x2c   : > { %s250_s10 = sshll.u32 %s249_s11, 4  ;;  %s244_s7 = scalar_lea.vmem [#allocation7], %s694_s26  ;;  %s251_s10 = int_to_ptr.hbm [resolvable:$true] %s250_s10 }
  0x2d   : > { %s252_s1 = sshll.u32 %s244_s7, 4  ;;  %s1030_s12 = smov 16   ;;  %s253_s1 = int_to_ptr.vmem [resolvable:$true] %s252_s1 }
  0x2e   : > { %s1031_s6 = smov 1   ;;  %s271_s23 = scalar_lea.hbm %s1262_s3, %s695_s29 }
  0x2f   : > { %740 = dma.hbm_to_vmem [thread:$0]  (!%p1134_p0), %s251_s10, 32, %s253_s1, %s1142_s24, %s1030_s12, %s1030_s12, %s1031_s6  }
  0x30   : > { %s266_s14 = scalar_lea.vmem [#allocation8], %s694_s26  ;;  %s272_s22 = sshll.u32 %s271_s23, 4  ;;  %s273_s22 = int_to_ptr.hbm [resolvable:$true] %s272_s22 }
  0x31   : > { %s274_s13 = sshll.u32 %s266_s14, 4  ;;  %s263_s17 = scalar_lea.sflag [#allocation9], %s1128_s5  ;;  %s275_s13 = int_to_ptr.vmem [resolvable:$true] %s274_s13 }
  0x32   : > { %743 = dma.hbm_to_vmem [thread:$0]  (!%p1134_p0), %s273_s22, 32, %s275_s13, %s263_s17, %s1030_s12, %s1030_s12, %s1031_s6  }
  0x33   : > { %286 = sbr.rel (%p1149_p3) target bundleno = 243 (0xf3), region = 36  ;;  %s1178_s20 = sand.u32 (!%p1149_p3), 1, %s1008_s16  }
  0x34   : > { %s699_s24 = sshll.u32 (!%p1149_p3), %s1178_s20, 3  ;;  %s289_s0 = scalar_lea.sflag (!%p1149_p3), [#allocation3], %s1178_s20 }
  0x35   : > { %s1182_s29 = scalar_lea.vmem (!%p1149_p3), [#allocation2], %s699_s24 }
  0x38   : > { %987 = dma.done.wait (%p1110_p8), %s289_s0, 128  }
  0x39   : > { %989 = vsyncadd (%p1110_p8), %s289_s0, 4294967168  ;;  %s298_s30 = sand.u32 1, %s1090_s21   ;;  %s700_s5 = sshll.u32 %s1178_s20, 6 }
  0x3a   : > { %s299_s8 = scalar_lea.sflag [#allocation6], %s298_s30  ;;  %s1190_s9 = scalar_lea.vmem [#allocation5], %s700_s5 }
  0x3b   : > { %991 = dma.done.wait (%p1110_p8), %s299_s8, 1056  }
  0x3c   : > { %993 = vsyncadd (%p1110_p8), %s299_s8, 4294966240  ;;  %s701_s25 = sshll.u32 %s1178_s20, 1  ;;  %s319_s11 = scalar_lea.sflag [#allocation9], %s1178_s20 }
  0x3d   : > { %s1197_s26 = scalar_lea.vmem [#allocation7], %s701_s25  ;;  %s1200_s10 = scalar_lea.vmem [#allocation8], %s701_s25 }
  0x3e   : > { %995 = dma.done.wait (%p1110_p8), %s319_s11, 32  }
  0x3f   : > { %997 = vsyncadd (%p1110_p8), %s319_s11, 4294967264  ;;  %v372_v0 = vld [vmem:[%s1190_s9 + $0x18] sm:$0xff]  ;;  %v371_v10 = vld [vmem:[%s1190_s9 + $0x10] sm:$0xff]  ;;  %s703_s21 = sshll.u32 %s1178_s20, 4  ;;  %s720_s27 = sshll.u32 %s1016_s18, 4 }
  0x40   : > { %v708_v1 = vld [vmem:[%s1190_s9 + $0x38] sm:$0xff]  ;;  %v387_v2 = vunpack.c.2.s8 %v372_v0  ;;  %v388_v3 = vunpack.c.3.s8 %v372_v0  ;;  %v385_v6 = vunpack.c.0.s8 %v372_v0  ;;  %v386_v7 = vunpack.c.1.s8 %v372_v0  ;;  %v707_v15 = vld [vmem:[%s1190_s9 + $0x30] sm:$0xff]  ;;  %v370_v32 = vld [vmem:[%s1190_s9 + $0x8] sm:$0xff]  ;;  %s526_s12 = scalar_lea.hbm %s1263_s4, %s720_s27  ;;  %s362_s6 = scalar_lea.vmem [#allocation10], %s703_s21 }
  0x41   : > { %v459_v4 = vunpack.c.2.s8 %v708_v1  ;;  %v460_v5 = vunpack.c.3.s8 %v708_v1  ;;  %v457_v8 = vunpack.c.0.s8 %v708_v1  ;;  %v458_v9 = vunpack.c.1.s8 %v708_v1  ;;  %v706_v37 = vld [vmem:[%s1190_s9 + $0x28] sm:$0xff]  ;;  %v369_v54 = vld [vmem:[%s1190_s9] sm:$0xff]  ;;  %s527_s23 = sshll.u32 %s362_s6, 4  ;;  %s529_s14 = sshll.u32 %s526_s12, 4  ;;  %s528_s23 = int_to_ptr.vmem [resolvable:$true] %s527_s23  ;;  %s530_s14 = int_to_ptr.hbm [resolvable:$true] %s529_s14 }
  0x42   : > { %v403_v11 = vcvt.s32.f32 %v387_v2  ;;  %v404_v12 = vcvt.s32.f32 %v388_v3  ;;  %v401_v16 = vcvt.s32.f32 %v385_v6  ;;  %v402_v17 = vcvt.s32.f32 %v386_v7  ;;  %v705_v59 = vld [vmem:[%s1190_s9 + $0x20] sm:$0xff]  ;;  %s514_s18 = scalar_lea.sflag [#allocation4], %s1178_s20  ;;  %s948_s13 = sshra.s32 %s530_s14, 4  ;;  %s949_s13 = int_to_ptr.hbm [resolvable:$true] %s948_s13 }
  0x43   : > { %v475_v13 = vcvt.s32.f32 %v459_v4  ;;  %v476_v14 = vcvt.s32.f32 %v460_v5  ;;  %v473_v18 = vcvt.s32.f32 %v457_v8  ;;  %v474_v19 = vcvt.s32.f32 %v458_v9  ;;  %s950_s22 = scalar_lea.hbm %s949_s13, 16  ;;  %s954_s0 = scalar_lea.hbm %s1263_s4, 32 }
  0x44   : > { %v412_v20 = vpack.c.bf16 %v404_v12, %v403_v11  ;;  %v383_v22 = vunpack.c.2.s8 %v371_v10  ;;  %v384_v23 = vunpack.c.3.s8 %v371_v10  ;;  %v411_v24 = vpack.c.bf16 %v402_v17, %v401_v16  ;;  %p951_p4 = scmp.ne.s32.totalorder %s949_s13, %s950_s22  ;;  %p955_p7 = scmp.lt.s32.totalorder %s949_s13, %s1263_s4 }
  0x45   : > { %v484_v21 = vpack.c.bf16 %v476_v14, %v475_v13  ;;  %v483_v25 = vpack.c.bf16 %v474_v19, %v473_v18  ;;  %v455_v26 = vunpack.c.2.s8 %v707_v15  ;;  %v456_v27 = vunpack.c.3.s8 %v707_v15  ;;  %p956_p8 = scmp.lt.s32.totalorder %s954_s0, %s950_s22 }
  0x46   : > { %413 = vmatpush.bf16.msra.mxu0 %v412_v20  ;;  %v399_v28 = vcvt.s32.f32 %v383_v22  ;;  %v400_v29 = vcvt.s32.f32 %v384_v23  ;;  %v381_v30 = vunpack.c.0.s8 %v371_v10  ;;  %v382_v31 = vunpack.c.1.s8 %v371_v10  ;;  %p952_p5 = pnand %p951_p4, %p1114_p9 }
  0x47   : > { %485 = vmatpush.bf16.msra.mxu1 %v484_v21  ;;  %v471_v33 = vcvt.s32.f32 %v455_v26  ;;  %v472_v34 = vcvt.s32.f32 %v456_v27  ;;  %v453_v35 = vunpack.c.0.s8 %v707_v15  ;;  %v454_v36 = vunpack.c.1.s8 %v707_v15  ;;  %v806_v26 = vld [vmem:[%s1197_s26] ss:$0 sm:$0xff]  ;;  %v808_v27 = vld [vmem:[%s1197_s26 + $0x1] ss:$0 sm:$0xff]  ;;  %p957_p10 = por %p956_p8, %p955_p7 }
  0x48   : > { %v410_v38 = vpack.c.bf16 %v400_v29, %v399_v28  ;;  %v397_v39 = vcvt.s32.f32 %v381_v30  ;;  %v398_v41 = vcvt.s32.f32 %v382_v31  ;;  %v379_v43 = vunpack.c.2.s8 %v370_v32  ;;  %v807_v28 = vld [vmem:[%s1200_s10] ss:$0 sm:$0xff]  ;;  %v809_v29 = vld [vmem:[%s1200_s10 + $0x1] ss:$0 sm:$0xff]  ;;  %p953_p6 = pneg %p952_p5 }
  0x49   : > { %v482_v40 = vpack.c.bf16 %v472_v34, %v471_v33  ;;  %v469_v42 = vcvt.s32.f32 %v453_v35  ;;  %v470_v44 = vcvt.s32.f32 %v454_v36  ;;  %v380_v45 = vunpack.c.3.s8 %v370_v32 }
  0x4a   : > { %414 = vmatpush.bf16.msra.mxu0 %v411_v24  ;;  %v451_v46 = vunpack.c.2.s8 %v706_v37  ;;  %v452_v47 = vunpack.c.3.s8 %v706_v37  ;;  %v377_v48 = vunpack.c.0.s8 %v370_v32  ;;  %v378_v49 = vunpack.c.1.s8 %v370_v32  ;;  %v368_v24 = vld [vmem:[%s1182_s29] sm:$0xf]  ;;  %p958_p13 = pnand %p957_p10, %p953_p6 }
  0x4b   : > { %486 = vmatpush.bf16.msra.mxu1 %v483_v25  ;;  %v409_v50 = vpack.c.bf16 %v398_v41, %v397_v39  ;;  %v395_v51 = vcvt.s32.f32 %v379_v43  ;;  %v449_v52 = vunpack.c.0.s8 %v706_v37  ;;  %v450_v53 = vunpack.c.1.s8 %v706_v37  ;;  %v704_v25 = vld [vmem:[%s1182_s29 + $0x4] sm:$0xf] }
  0x4c   : > { %v481_v55 = vpack.c.bf16 %v470_v44, %v469_v42  ;;  %v396_v56 = vcvt.s32.f32 %v380_v45  ;;  %v467_v57 = vcvt.s32.f32 %v451_v46  ;;  %v468_v58 = vcvt.s32.f32 %v452_v47 }
  0x4d   : > { %v393_v60 = vcvt.s32.f32 %v377_v48  ;;  %v394_v61 = vcvt.s32.f32 %v378_v49  ;;  %v375_v62 = vunpack.c.2.s8 %v369_v54  ;;  %v465_v63 = vcvt.s32.f32 %v449_v52 }
  0x4e   : > { %415 = vmatpush.bf16.msra.mxu0 %v410_v38  ;;  %v466_v0 = vcvt.s32.f32 %v450_v53  ;;  %v376_v1 = vunpack.c.3.s8 %v369_v54  ;;  %v408_v2 = vpack.c.bf16 %v396_v56, %v395_v51  ;;  %v480_v3 = vpack.c.bf16 %v468_v58, %v467_v57 }
  0x4f   : > { %487 = vmatpush.bf16.msra.mxu1 %v482_v40  ;;  %v447_v4 = vunpack.c.2.s8 %v705_v59  ;;  %v448_v5 = vunpack.c.3.s8 %v705_v59  ;;  %v407_v6 = vpack.c.bf16 %v394_v61, %v393_v60  ;;  %v391_v7 = vcvt.s32.f32 %v375_v62 }
  0x50   : > { %v479_v8 = vpack.c.bf16 %v466_v0, %v465_v63  ;;  %v392_v9 = vcvt.s32.f32 %v376_v1  ;;  %v373_v10 = vunpack.c.0.s8 %v369_v54  ;;  %v374_v11 = vunpack.c.1.s8 %v369_v54 }
  0x51   : > { %v463_v12 = vcvt.s32.f32 %v447_v4  ;;  %v464_v13 = vcvt.s32.f32 %v448_v5  ;;  %v445_v14 = vunpack.c.0.s8 %v705_v59  ;;  %v446_v15 = vunpack.c.1.s8 %v705_v59 }
  0x52   : > { %416 = vmatpush.bf16.msra.mxu0 %v409_v50  ;;  %v406_v16 = vpack.c.bf16 %v392_v9, %v391_v7  ;;  %v389_v17 = vcvt.s32.f32 %v373_v10  ;;  %v390_v19 = vcvt.s32.f32 %v374_v11 }
  0x53   : > { %488 = vmatpush.bf16.msra.mxu1 %v481_v55  ;;  %v478_v18 = vpack.c.bf16 %v464_v13, %v463_v12  ;;  %v461_v20 = vcvt.s32.f32 %v445_v14  ;;  %v462_v21 = vcvt.s32.f32 %v446_v15 }
  0x54   : > { %v405_v22 = vpack.c.bf16 %v390_v19, %v389_v17 }
  0x55   : > { %v477_v23 = vpack.c.bf16 %v462_v21, %v461_v20 }
  0x56   : > { %417 = vmatpush.bf16.msra.mxu0 %v408_v2 }
  0x57   : > { %489 = vmatpush.bf16.msra.mxu1 %v480_v3 }
  0x5a   : > { %418 = vmatpush.bf16.msra.mxu0 %v407_v6 }
  0x5b   : > { %490 = vmatpush.bf16.msra.mxu1 %v479_v8 }
  0x5e   : > { %419 = vmatpush.bf16.msra.mxu0 %v406_v16 }
  0x5f   : > { %491 = vmatpush.bf16.msra.mxu1 %v478_v18 }
  0x62   : > { %420 = vmatpush.bf16.msra.mxu0 %v405_v22 }
  0x63   : > { %492 = vmatpush.bf16.msra.mxu1 %v477_v23 }
  0x65   : > { %421 = vmatmul.bf16.vlgmr.msra.gmra.mxu0 %v368_v24 }
  0x66   : > { %493 = vmatmul.bf16.vlgmr.msra.gmra.mxu1 %v704_v25 }
  0xe2   : > { %v422_v30 = vpop.f32.mrf.mxu0 }
  0xe3   : > { %v494_v31 = vpop.f32.mrf.mxu1  ;;  %v430_v32 = vmul.f32 %v806_v26, %v422_v30 }
  0xe4   : > { %v503_v33 = vmul.f32 %v808_v27, %v494_v31 }
  0xe5   : > { %v435_v34 = vadd.f32 %v807_v28, %v430_v32 }
  0xe6   : > { %v509_v35 = vadd.f32 %v809_v29, %v503_v33 }
  0xe7   : > { %810 = vtanh.f32 %v435_v34 }
  0xe8   : > { %812 = vtanh.f32 %v509_v35 }
  0xea   : > { %v424_v36 = vpop.f32.mrf.mxu0 }
  0xeb   : > { %v496_v37 = vpop.f32.mrf.mxu1 }
  0xed   : > { %v811_v38 = vpop.eup %810 }
  0xee   : > { %v813_v39 = vpop.eup %812  ;;  %437 = vst [vmem:[%s362_s6] sm:$0xff] %v811_v38 }
  0xef   : > { %711 = vst [vmem:[%s362_s6 + $0x8] sm:$0xff] %v813_v39 }
  0xf0   : > { %961 = shalt.err (!%p958_p13)
}
  0xf1   : > { %s1032_s20 = smov 128   ;;  %s1033_s5 = smov 8  }
  0xf2   : > { %729 = dma.vmem_to_hbm [thread:$0]  (%p1114_p9), %s528_s23, 256, %s530_s14, %s514_s18, %s1032_s20, %s1032_s20, %s1033_s5  }
  0xf3 PF: > { %s1285_s9 = sld [smem:[#allocation16_spill]]  ;;  %s544_s25 = sand.u32 1, %s1004_s15  }
  0xf4   : > { %p745_p0 = pnand %p686_p12, %p1121_p11  ;;  %s545_s26 = scalar_lea.sflag [#allocation4], %s544_s25 }
  0xf6   : > { %p746_p1 = pneg %p745_p0 }
  0xf8   : > { %999 = dma.done.wait (%p746_p1), %s545_s26, 256  }
  0xf9   : > { %1001 = vsyncadd (%p746_p1), %s545_s26, 4294967040  ;;  %s26_s20 = sadd.s32 1, %s1285_s9   ;;  %s1286_s11 = sld [smem:[#allocation15_spill]] }
  0xfa   : > { %p23_p2 = scmp.ge.s32.totalorder %s26_s20, 4   ;;  %s1287_s17 = sld [smem:[#allocation18_spill]] }
  0xfb   : > { %s1288_s28 = sld [smem:[#allocation17_spill]]  ;;  %s1289_s15 = smov %s1008_s16 }
  0xfc   : > { %s1291_s18 = smov %s1020_s19 }
  0xfd   :  { %25 = sbr.rel (!%p23_p2) target bundleno = 13 (0xd), region = 123 }
  0xff   : > { %s1290_s16 = smov %s1286_s11 }
 0x101   : > { %s1292_s19 = smov %s1288_s28 }
 0x102   :  { %551 = vsyncpa [#allocation3], 1 }
 0x103   :  { %553 = vsyncpa [#allocation3 + $0x1], 1 }
 0x104   :  { %554 = vsyncpa [#allocation6], 1 }
 0x105   :  { %556 = vsyncpa [#allocation6 + $0x1], 1 }
 0x106   :  { %557 = vsyncpa [#allocation9], 1 }
 0x107   :  { %559 = vsyncpa [#allocation9 + $0x1], 1 }
 0x108   :  { %560 = vsyncpa [#allocation4], 1 }
 0x109   :  { %562 = vsyncpa [#allocation4 + $0x1], 1 }

</bundles_post_ra>
